<compile_context>
chip_gen: v7x
topology: tpu7x:2x2x1
jax: 0.10.0
libtpu: 0.0.40
codegen_flags: <defaults>
</compile_context>

<pallas_src>
import jax
import jax.numpy as jnp
from jax.experimental import pallas as pl
from jax.experimental.pallas import tpu as pltpu

BN_EPS = 1e-5


def _vmem_limit_bytes() -> int:
    """Generation-aware scoped-VMEM limit.

    Stays well under physical capacity (v7x: 64 MiB, v5e/v6e: 128 MiB) while
    raising v5e's 16 MiB scoped default so large tiles don't trip it.
    """
    try:
        cap = int(pltpu.get_tpu_info().vmem_capacity_bytes)
    except Exception:
        cap = 64 * 1024 * 1024  # conservative fallback (v7x physical size)
    return min(64 * 1024 * 1024, max(32 * 1024 * 1024, cap // 2))


def _footprint_bytes(tb, in_features, hidden, out_features, x_itemsize, w1_itemsize):
    """Approximate VMEM working set for a batch tile of `tb` rows."""
    # Resident parameters: Pallas double-buffers every input spec by default.
    # TODO(synk): pipeline_mode=pl.Buffered(1) on the resident specs would
    # halve this (their block index never changes).
    resident = 2 * (in_features * hidden * w1_itemsize
                    + 4 * (2 * hidden + hidden * out_features + out_features))
    # Per-tile: double-buffered x / out tiles plus ~4 f32 [tb, hidden]
    # intermediates (h, normalized h, temporaries) and the stats scratch.
    tile = (2 * tb * in_features * x_itemsize
            + 2 * tb * out_features * 4
            + 4 * tb * hidden * 4
            + 2 * 2 * hidden * 4)
    return resident + tile


def _make_single_pass_kernel(total_batch: int, reduce_fc2: bool):
    inv_n = 1.0 / total_batch

    def kernel(x_ref, w1_ref, gamma_ref, beta_ref, w2_ref, b2_ref, out_ref):
        # fc1 (bias omitted: cancelled exactly by training-mode BN mean
        # subtraction).  Whole batch in one tile -> done exactly once.
        h = jnp.dot(x_ref[...], w1_ref[...], preferred_element_type=jnp.float32)

        # Full-batch BatchNorm statistics (training mode, biased variance).
        # Centered two-pass variance: robust, never negative.
        mean = jnp.sum(h, axis=0, keepdims=True) * inv_n              # [1, H]
        hc = h - mean
        var = jnp.sum(hc * hc, axis=0, keepdims=True) * inv_n         # [1, H]
        inv_std = jax.lax.rsqrt(var + BN_EPS)
        scale = gamma_ref[...] * inv_std                              # [1, H]

        # Fused BN affine + ReLU: one [B, H] VPU pass.
        hn = jnp.maximum(hc * scale + beta_ref[...], 0.0)

        if reduce_fc2:
            # out_features == 1: VPU multiply + lane (XLU) reduction instead of
            # an N=1 MXU matmul.  w2 is pre-reshaped to [1, H].
            y = jnp.sum(hn * w2_ref[...], axis=-1, keepdims=True)
        else:
            y = jnp.dot(hn, w2_ref[...], preferred_element_type=jnp.float32)
        y = y + b2_ref[...]
        # TODO(synk): for out_features == 1 a lane-dense (1, B) output layout
        # would avoid the masked (B, 1) column store; negligible at this size.
        out_ref[...] = jnp.clip(y, 0.0, 6.0).astype(out_ref.dtype)

    return kernel


def _make_two_phase_kernel(total_batch: int, tile_rows: int,
                           reduce_fc2: bool, ragged: bool):
    inv_n = 1.0 / total_batch

    def kernel(x_ref, w1_ref, gamma_ref, beta_ref, w2_ref, b2_ref,
               out_ref, sum_ref, sumsq_ref):
        phase = pl.program_id(0)
        tile = pl.program_id(1)

        # fc1 for this batch tile (recomputed in each phase; weights resident).
        # fc1 bias omitted: cancelled exactly by training-mode BatchNorm.
        h = jnp.dot(x_ref[...], w1_ref[...], preferred_element_type=jnp.float32)

        # ---- phase 0: accumulate full-batch BN statistics -------------------
        @pl.when(phase == 0)
        def _():
            @pl.when(tile == 0)
            def _():
                sum_ref[...] = jnp.zeros_like(sum_ref)
                sumsq_ref[...] = jnp.zeros_like(sumsq_ref)

            if ragged:
                # Mask rows past the true batch in the last (partial) tile.
                row = jax.lax.broadcasted_iota(jnp.int32, h.shape, 0)
                valid = (tile * tile_rows + row) < total_batch
                hm = jnp.where(valid, h, 0.0)
            else:
                hm = h
            # TODO(synk): accumulate into an [8, H] (one-vreg-tall) partial-sum
            # scratch (pure VPU adds) and collapse sublanes once in phase 1.
            sum_ref[...] += jnp.sum(hm, axis=0, keepdims=True)
            sumsq_ref[...] += jnp.sum(hm * hm, axis=0, keepdims=True)

        # ---- phase 1: normalize + ReLU + fc2 + ReLU6, write output ----------
        @pl.when(phase == 1)
        def _():
            mean = sum_ref[...] * inv_n                                # [1, H]
            # One-pass biased variance, clamped >= 0 against f32 cancellation
            # (avoids NaN from rsqrt when the variance is tiny).
            var = jnp.maximum(sumsq_ref[...] * inv_n - mean * mean, 0.0)
            inv_std = jax.lax.rsqrt(var + BN_EPS)
            scale = gamma_ref[...] * inv_std                           # [1, H]
            shift = beta_ref[...] - mean * scale                       # [1, H]
            # Fused BN affine + ReLU: one [TB, H] VPU pass.
            hn = jnp.maximum(h * scale + shift, 0.0)

            if reduce_fc2:
                y = jnp.sum(hn * w2_ref[...], axis=-1, keepdims=True)
            else:
                y = jnp.dot(hn, w2_ref[...], preferred_element_type=jnp.float32)
            y = y + b2_ref[...]
            out_ref[...] = jnp.clip(y, 0.0, 6.0).astype(out_ref.dtype)

    return kernel


def ranknet_mlp(x, w1, b1, gamma, beta, w2, b2, *,
                matmul_dtype=None, max_batch_tile=None):
    """RankNetMLP forward (training-mode BatchNorm).

    x: [B, in]; w1: [in, H]; b1: [1, H] (mathematically cancelled by BN);
    gamma/beta: [1, H]; w2: [H, out]; b2: [1, out].  Returns [B, out] float32.

    matmul_dtype: e.g. jnp.bfloat16 for the fc1 operands (relax tolerance to
    ~1e-1).  max_batch_tile: optional cap on the batch tile (mainly for
    exercising the multi-tile path at small sizes).
    """
    del b1  # fc1 bias has no effect under training-mode BatchNorm.
    batch, in_features = x.shape
    hidden = w1.shape[1]
    out_features = w2.shape[1]

    if matmul_dtype is not None:
        # Halves x HBM traffic and matches native MXU rate; stats/BN/fc2 stay f32.
        x = x.astype(matmul_dtype)
        w1 = w1.astype(matmul_dtype)

    reduce_fc2 = (out_features == 1)
    w2_k = w2.reshape(1, hidden) if reduce_fc2 else w2
    params = (w1, gamma, beta, w2_k, b2)

    vmem_limit = _vmem_limit_bytes()
    budget = (vmem_limit * 3) // 4
    x_isz = x.dtype.itemsize
    w1_isz = w1.dtype.itemsize

    def fits(tb):
        return _footprint_bytes(tb, in_features, hidden, out_features,
                                x_isz, w1_isz) <= budget

    def resident_spec(a):
        return pl.BlockSpec(a.shape, lambda *_: (0,) * a.ndim)

    out_shape = jax.ShapeDtypeStruct((batch, out_features), jnp.float32)
    elem_flops = 8 * batch * hidden + 2 * batch * hidden * out_features
    param_bytes = (w1.size * w1_isz
                   + 4 * (gamma.size + beta.size + w2_k.size + b2.size))

    single_pass = fits(batch) and (max_batch_tile is None or batch <= max_batch_tile)

    if single_pass:
        # ---- single-pass fast path: one grid step, x read once, fc1 once ----
        kernel = _make_single_pass_kernel(batch, reduce_fc2)
        flops = 2 * batch * in_features * hidden + elem_flops
        bytes_accessed = (batch * in_features * x_isz
                          + 4 * batch * out_features + param_bytes)
        return pl.pallas_call(
            kernel,
            out_shape=out_shape,
            grid=(1,),
            in_specs=[pl.BlockSpec((batch, in_features), lambda i: (0, 0))]
                     + [resident_spec(a) for a in params],
            out_specs=pl.BlockSpec((batch, out_features), lambda i: (0, 0)),
            compiler_params=pltpu.CompilerParams(
                dimension_semantics=("arbitrary",),
                vmem_limit_bytes=int(vmem_limit)),
            cost_estimate=pl.CostEstimate(
                flops=int(flops), transcendentals=int(hidden),
                bytes_accessed=int(bytes_accessed)),
        )(x, *params)

    # ---- two-phase batch-tiled path (large / forced-tiled batches) ----------
    tb = 8
    cap = batch if max_batch_tile is None else min(batch, max_batch_tile)
    for cand in (16384, 8192, 4096, 2048, 1024, 512, 256, 128, 64, 32, 16, 8):
        if cand <= cap and fits(cand):
            tb = cand
            break
    nb = pl.cdiv(batch, tb)
    ragged = (batch % tb) != 0
    grid = (2, nb)  # (phase, batch tile)

    kernel = _make_two_phase_kernel(batch, tb, reduce_fc2, ragged)
    padded = nb * tb
    flops = 4 * padded * in_features * hidden + elem_flops    # fc1 twice (two phases)
    # TODO(synk): for in_features >> hidden, stash bf16 h to HBM in phase 0 and
    # read it back in phase 1 instead of recomputing fc1 (less HBM + MXU work).
    bytes_accessed = (2 * padded * in_features * x_isz        # x read twice
                      + 4 * batch * out_features + param_bytes)

    return pl.pallas_call(
        kernel,
        out_shape=out_shape,
        grid=grid,
        in_specs=[pl.BlockSpec((tb, in_features), lambda p, b: (b, 0))]   # x (tiled)
                 + [resident_spec(a) for a in params],
        # Every phase-0 step maps to output block 0 (p*b == 0 when p == 0), so
        # no garbage output tile is flushed before phase 1 writes real values.
        # NOTE: this relies on the phase axis staying sequential ("arbitrary").
        out_specs=pl.BlockSpec((tb, out_features), lambda p, b: (p * b, 0)),
        scratch_shapes=[
            pltpu.VMEM((1, hidden), jnp.float32),   # per-feature sum
            pltpu.VMEM((1, hidden), jnp.float32),   # per-feature sum of squares
        ],
        compiler_params=pltpu.CompilerParams(
            # Phase 1 needs the full-batch stats accumulated by all phase-0 tiles.
            # TODO(synk): on v7x, shard the batch-tile axis over the 2 TensorCores
            # (pl.core_map + pltpu.create_tensorcore_mesh) with a CMEM/core_barrier
            # reduction of the [1, H] stats.
            dimension_semantics=("arbitrary", "arbitrary"),
            vmem_limit_bytes=int(vmem_limit)),
        cost_estimate=pl.CostEstimate(
            flops=int(flops), transcendentals=int(hidden),
            bytes_accessed=int(bytes_accessed)),
    )(x, *params)


def _xavier_normal(key, fan_in, fan_out):
    # torch.nn.init.xavier_normal_ on a [out, in] weight: std = sqrt(2/(in+out)).
    std = (2.0 / (fan_in + fan_out)) ** 0.5
    return jax.random.normal(key, (fan_in, fan_out), dtype=jnp.float32) * std


def _reference(x, w1, b1, gamma, beta, w2, b2):
    h = x @ w1 + b1
    mean = h.mean(axis=0, keepdims=True)
    var = ((h - mean) ** 2).mean(axis=0, keepdims=True)   # biased (training mode)
    h = (h - mean) / jnp.sqrt(var + BN_EPS) * gamma + beta
    h = jnp.maximum(h, 0.0)
    return jnp.clip(h @ w2 + b2, 0.0, 6.0)


if __name__ == "__main__":
    # Small config consistent with the module: in_features=32, hidden=64, out=1.
    in_features, hidden_size, out_features = 32, 64, 1

    key = jax.random.PRNGKey(0)
    kx, kw1, kw2, kb1, kg, kbe = jax.random.split(key, 6)

    # Xavier-normal weights as in init_parameters(); biases / BN params given
    # non-trivial values to exercise the full forward pass (including the fc1
    # bias the kernel folds away under training-mode BN).
    w1 = _xavier_normal(kw1, in_features, hidden_size)                 # [in, H]
    b1 = 0.3 * jax.random.normal(kb1, (1, hidden_size), dtype=jnp.float32)
    gamma = 1.0 + 0.2 * jax.random.normal(kg, (1, hidden_size), dtype=jnp.float32)
    beta = 0.1 * jax.random.normal(kbe, (1, hidden_size), dtype=jnp.float32)
    w2 = _xavier_normal(kw2, hidden_size, out_features)                # [H, out]
    b2 = 0.05 * jnp.ones((1, out_features), dtype=jnp.float32)

    def run_case(batch, *, max_batch_tile=None, matmul_dtype=None,
                 atol=1e-4, rtol=1e-4):
        xkey = jax.random.fold_in(kx, batch)
        x = jax.random.normal(xkey, (batch, in_features), dtype=jnp.float32)
        out = ranknet_mlp(x, w1, b1, gamma, beta, w2, b2,
                          matmul_dtype=matmul_dtype, max_batch_tile=max_batch_tile)
        jax.block_until_ready(out)
        ref = _reference(x, w1, b1, gamma, beta, w2, b2)
        assert out.shape == (batch, out_features)
        err = float(jnp.max(jnp.abs(out - ref)))
        assert jnp.allclose(out, ref, atol=atol, rtol=rtol), (
            f"batch={batch} max_batch_tile={max_batch_tile} "
            f"matmul_dtype={matmul_dtype}: max abs err {err}")

    # 1) Demo shape -> single-pass fast path (one grid step, fc1 done once).
    run_case(8)
    # 2) Multi-tile two-phase path (forced tb=8 -> grid=(2, 4)).
    run_case(32, max_batch_tile=8)
    # 3) Ragged batch -> cdiv grid, masked stats + masked output writeback.
    run_case(37, max_batch_tile=8)
    # 4) Optional bf16 fc1 operands (halved x HBM traffic); looser tolerance.
    run_case(8, matmul_dtype=jnp.bfloat16, atol=1e-1, rtol=1e-1)

    print("KERNEL_OK")
</pallas_src>

<mosaic_0001>
module attributes {stable_mosaic.version = 11 : i64} {
  func.func @kernel(%arg0: i32, %arg1: memref<8x32xf32, #tpu.memory_space<vmem>>, %arg2: memref<32x64xf32, #tpu.memory_space<vmem>>, %arg3: memref<1x64xf32, #tpu.memory_space<vmem>>, %arg4: memref<1x64xf32, #tpu.memory_space<vmem>>, %arg5: memref<1x64xf32, #tpu.memory_space<vmem>>, %arg6: memref<1x1xf32, #tpu.memory_space<vmem>>, %arg7: memref<8x1xf32, #tpu.memory_space<vmem>>) attributes {dimension_semantics = [#tpu.dimension_semantics<arbitrary>], iteration_bounds = array<i64: 1>, scalar_prefetch = 0 : i64, scratch_operands = 0 : i64, tpu.core_type = #tpu.core_type<tc>, window_params = [{pipeline_mode = #tpu.pipeline_mode<synchronous>, transform_indices = @transform_0, window_bounds = array<i64: 8, 32>}, {pipeline_mode = #tpu.pipeline_mode<synchronous>, transform_indices = @transform_1, window_bounds = array<i64: 32, 64>}, {pipeline_mode = #tpu.pipeline_mode<synchronous>, transform_indices = @transform_2, window_bounds = array<i64: 1, 64>}, {pipeline_mode = #tpu.pipeline_mode<synchronous>, transform_indices = @transform_3, window_bounds = array<i64: 1, 64>}, {pipeline_mode = #tpu.pipeline_mode<synchronous>, transform_indices = @transform_4, window_bounds = array<i64: 1, 64>}, {pipeline_mode = #tpu.pipeline_mode<synchronous>, transform_indices = @transform_5, window_bounds = array<i64: 1, 1>}, {pipeline_mode = #tpu.pipeline_mode<synchronous>, transform_indices = @transform_6, window_bounds = array<i64: 8, 1>}]} {
    %c0 = arith.constant 0 : index
    %c0_0 = arith.constant 0 : index
    %0 = vector.load %arg1[%c0, %c0_0] : memref<8x32xf32, #tpu.memory_space<vmem>>, vector<8x32xf32>
    %c0_1 = arith.constant 0 : index
    %c0_2 = arith.constant 0 : index
    %1 = vector.load %arg2[%c0_1, %c0_2] : memref<32x64xf32, #tpu.memory_space<vmem>>, vector<32x64xf32>
    %cst = arith.constant dense<0.000000e+00> : vector<8x64xf32>
    %2 = tpu.matmul %0, %1, %cst {dimension_numbers = #tpu.dot_dimension_numbers<[1], [0], [0], [1], [0, 0, 1, 1], [], []>} : vector<8x32xf32>, vector<32x64xf32>, vector<8x64xf32> -> vector<8x64xf32>
    %cst_3 = arith.constant dense<0.000000e+00> : vector<64xf32>
    %3 = vector.multi_reduction <add>, %2, %cst_3 [0] : vector<8x64xf32> to vector<64xf32>
    %4 = vector.shape_cast %3 : vector<64xf32> to vector<1x64xf32>
    %cst_4 = arith.constant 1.250000e-01 : f32
    %5 = vector.broadcast %cst_4 : f32 to vector<1x64xf32>
    %6 = arith.mulf %4, %5 : vector<1x64xf32>
    %7 = vector.broadcast %6 : vector<1x64xf32> to vector<8x64xf32>
    %8 = arith.subf %2, %7 : vector<8x64xf32>
    %9 = arith.mulf %8, %8 : vector<8x64xf32>
    %cst_5 = arith.constant dense<0.000000e+00> : vector<64xf32>
    %10 = vector.multi_reduction <add>, %9, %cst_5 [0] : vector<8x64xf32> to vector<64xf32>
    %11 = vector.shape_cast %10 : vector<64xf32> to vector<1x64xf32>
    %cst_6 = arith.constant 1.250000e-01 : f32
    %12 = vector.broadcast %cst_6 : f32 to vector<1x64xf32>
    %13 = arith.mulf %11, %12 : vector<1x64xf32>
    %cst_7 = arith.constant 9.99999974E-6 : f32
    %14 = vector.broadcast %cst_7 : f32 to vector<1x64xf32>
    %15 = arith.addf %13, %14 : vector<1x64xf32>
    %16 = math.rsqrt %15 : vector<1x64xf32>
    %c0_8 = arith.constant 0 : index
    %c0_9 = arith.constant 0 : index
    %17 = vector.load %arg3[%c0_8, %c0_9] : memref<1x64xf32, #tpu.memory_space<vmem>>, vector<1x64xf32>
    %18 = arith.mulf %17, %16 : vector<1x64xf32>
    %19 = vector.broadcast %18 : vector<1x64xf32> to vector<8x64xf32>
    %20 = arith.mulf %8, %19 : vector<8x64xf32>
    %c0_10 = arith.constant 0 : index
    %c0_11 = arith.constant 0 : index
    %21 = vector.load %arg4[%c0_10, %c0_11] : memref<1x64xf32, #tpu.memory_space<vmem>>, vector<1x64xf32>
    %22 = vector.broadcast %21 : vector<1x64xf32> to vector<8x64xf32>
    %23 = arith.addf %20, %22 : vector<8x64xf32>
    %cst_12 = arith.constant 0.000000e+00 : f32
    %24 = vector.broadcast %cst_12 : f32 to vector<8x64xf32>
    %25 = arith.maximumf %23, %24 : vector<8x64xf32>
    %c0_13 = arith.constant 0 : index
    %c0_14 = arith.constant 0 : index
    %26 = vector.load %arg5[%c0_13, %c0_14] : memref<1x64xf32, #tpu.memory_space<vmem>>, vector<1x64xf32>
    %27 = vector.broadcast %26 : vector<1x64xf32> to vector<8x64xf32>
    %28 = arith.mulf %25, %27 : vector<8x64xf32>
    %cst_15 = arith.constant dense<0.000000e+00> : vector<8xf32>
    %29 = vector.multi_reduction <add>, %28, %cst_15 [1] : vector<8x64xf32> to vector<8xf32>
    %30 = vector.shape_cast %29 : vector<8xf32> to vector<8x1xf32>
    %c0_16 = arith.constant 0 : index
    %c0_17 = arith.constant 0 : index
    %31 = vector.load %arg6[%c0_16, %c0_17] : memref<1x1xf32, #tpu.memory_space<vmem>>, vector<1x1xf32>
    %32 = vector.broadcast %31 : vector<1x1xf32> to vector<8x1xf32>
    %33 = arith.addf %30, %32 : vector<8x1xf32>
    %cst_18 = arith.constant 0.000000e+00 : f32
    %cst_19 = arith.constant 6.000000e+00 : f32
    %34 = vector.broadcast %cst_18 : f32 to vector<8x1xf32>
    %35 = arith.maximumf %34, %33 : vector<8x1xf32>
    %36 = vector.broadcast %cst_19 : f32 to vector<8x1xf32>
    %37 = arith.minimumf %36, %35 : vector<8x1xf32>
    %c0_20 = arith.constant 0 : index
    %c0_21 = arith.constant 0 : index
    %38 = vector.load %arg7[%c0_20, %c0_21] : memref<8x1xf32, #tpu.memory_space<vmem>>, vector<8x1xf32>
    tpu.vector_store %arg7[%c0_20, %c0_21], %37 {strides = array<i32>} : memref<8x1xf32, #tpu.memory_space<vmem>>, vector<8x1xf32>,
    return
  }
  func.func @transform_0(%arg0: i32) -> (i32, i32) {
    %c0_i32 = arith.constant 0 : i32
    %c0_i32_0 = arith.constant 0 : i32
    %c0_i32_1 = arith.constant 0 : i32
    return %c0_i32, %c0_i32_0 : i32, i32
  }
  func.func @transform_1(%arg0: i32) -> (i32, i32) {
    %c0_i32 = arith.constant 0 : i32
    %c0_i32_0 = arith.constant 0 : i32
    %c0_i32_1 = arith.constant 0 : i32
    return %c0_i32, %c0_i32_0 : i32, i32
  }
  func.func @transform_2(%arg0: i32) -> (i32, i32) {
    %c0_i32 = arith.constant 0 : i32
    %c0_i32_0 = arith.constant 0 : i32
    %c0_i32_1 = arith.constant 0 : i32
    return %c0_i32, %c0_i32_0 : i32, i32
  }
  func.func @transform_3(%arg0: i32) -> (i32, i32) {
    %c0_i32 = arith.constant 0 : i32
    %c0_i32_0 = arith.constant 0 : i32
    %c0_i32_1 = arith.constant 0 : i32
    return %c0_i32, %c0_i32_0 : i32, i32
  }
  func.func @transform_4(%arg0: i32) -> (i32, i32) {
    %c0_i32 = arith.constant 0 : i32
    %c0_i32_0 = arith.constant 0 : i32
    %c0_i32_1 = arith.constant 0 : i32
    return %c0_i32, %c0_i32_0 : i32, i32
  }
  func.func @transform_5(%arg0: i32) -> (i32, i32) {
    %c0_i32 = arith.constant 0 : i32
    %c0_i32_0 = arith.constant 0 : i32
    %c0_i32_1 = arith.constant 0 : i32
    return %c0_i32, %c0_i32_0 : i32, i32
  }
  func.func @transform_6(%arg0: i32) -> (i32, i32) {
    %c0_i32 = arith.constant 0 : i32
    %c0_i32_0 = arith.constant 0 : i32
    %c0_i32_1 = arith.constant 0 : i32
    return %c0_i32, %c0_i32_0 : i32, i32
  }
}

</mosaic_0001>

<bundles_post_ra>
// kernel: tpu_custom_call.1
= control target key start
LH: loop header
LB: loop body
LE: loop exit
PB: predicated region body
PF: predicated region fallthrough
CT: control target
= control target key end

     0   :  { %s372_s0 = inlined_call_operand.hbm [shape: f32[8,32], index: 0, kind: input, shape index: {}]   ;;  %s373_s1 = inlined_call_operand.hbm [shape: f32[32,64], index: 1, kind: input, shape index: {}]   ;;  %s374_s2 = inlined_call_operand.vmem [shape: f32[1,64], index: 2, kind: input, shape index: {}]   ;;  %s375_s3 = inlined_call_operand.vmem [shape: f32[1,64], index: 3, kind: input, shape index: {}]   ;;  %s376_s4 = inlined_call_operand.vmem [shape: f32[1,64], index: 4, kind: input, shape index: {}]   ;;  %s377_s5 = inlined_call_operand.<no memory space> [shape: f32[1,1], index: 5, kind: input, shape index: {}]   ;;  %s378_s6 = inlined_call_operand.vmem [shape: f32[8,1], index: 6, kind: output, shape index: {}]  }
   0x1   :  { %v11_v0 = vstv %s377_s5 }
   0x2   :  { %12 = vst [vmem:[#allocation2] sm:$0x1] %v11_v0 }
   0x3   :  { %13 = vsyncpa [#allocation4], 0 }
   0x4   :  { %14 = vsyncpa [#allocation6], 0  ;;  %s281_s23 = smov [#allocation3]   ;;  %s282_s25 = smov [#allocation5]  }
   0x5   :  { %s21_s24 = sshll.u32 %s281_s23, 4  ;;  %s30_s26 = sshll.u32 %s282_s25, 4  ;;  %s22_s24 = int_to_ptr.vmem [resolvable:$true] %s21_s24  ;;  %s326_s26 = int_to_ptr.vmem [resolvable:$true] %s30_s26 }
   0x6   :  { %s233_s29 = scalar_lea.hbm %s372_s0, 128 }
   0x7   :  { %p234_p0 = scmp.ne.s32.totalorder %s372_s0, %s233_s29  ;;  %p237_p1 = scmp.lt.u32.totalorder %s233_s29, %s372_s0 }
   0x9   :  { %p239_p2 = pnand %p237_p1, %p234_p0 }
   0xb   :  { %242 = shalt.err (!%p239_p2)
}
   0xc   :  { %s243_s9 = scalar_lea.vmem %s22_s24, 128  ;;  %p248_p4 = scmp.lt.s32.totalorder %s22_s24, %s22_s24 }
   0xd   :  { %p244_p3 = scmp.ne.s32.totalorder %s22_s24, %s243_s9  ;;  %p249_p5 = scmp.lt.s32.totalorder %s243_s9, %s243_s9 }
   0xf   :  { %p250_p6 = por %p249_p5, %p248_p4 }
  0x11   :  { %p251_p7 = pnand %p250_p6, %p244_p3 }
  0x13   :  { %254 = shalt.err (!%p251_p7)
}
  0x14   :  { %24 = dma.hbm_to_vmem [thread:$0]  %s372_s0, 128, %s22_s24, [#allocation4]  }
  0x15   :  { %s255_s14 = scalar_lea.hbm %s373_s1, 512 }
  0x16   :  { %p256_p8 = scmp.ne.s32.totalorder %s373_s1, %s255_s14  ;;  %p259_p9 = scmp.lt.u32.totalorder %s255_s14, %s373_s1 }
  0x18   :  { %p261_p10 = pnand %p259_p9, %p256_p8 }
  0x1a   :  { %264 = shalt.err (!%p261_p10)
}
  0x1b   :  { %s265_s19 = scalar_lea.vmem %s326_s26, 512  ;;  %p270_p12 = scmp.lt.s32.totalorder %s326_s26, %s326_s26 }
  0x1c   :  { %p266_p11 = scmp.ne.s32.totalorder %s326_s26, %s265_s19  ;;  %p271_p13 = scmp.lt.s32.totalorder %s265_s19, %s265_s19 }
  0x1e   :  { %p272_p0 = por %p271_p13, %p270_p12 }
  0x20   :  { %p273_p1 = pnand %p272_p0, %p266_p11 }
  0x22   :  { %276 = shalt.err (!%p273_p1)
}
  0x23   :  { %s283_s0 = smov 128   ;;  %s284_s20 = smov 8  }
  0x24   :  { %36 = dma.hbm_to_vmem [thread:$0]  %s373_s1, 512, %s326_s26, [#allocation6], %s283_s0, %s283_s0, %s284_s20  }
  0x25   :  { %277 = dma.done.wait [#allocation4], 128  }
  0x26   :  { %278 = vsyncadd [#allocation4], 4294967168 }
  0x27   :  { %279 = dma.done.wait [#allocation6], 512  }
  0x28   :  { %280 = vsyncadd [#allocation6], 4294966784  ;;  %v285_v1 = vmov 0.0|0.0   ;;  %vm286_vm0 = vmmov 0   ;;  %v287_v2 = vmov 0.0   ;;  %v52_v3 = vld [vmem:[#allocation5] sm:$0xff]  ;;  %v154_v31 = vlaneseq }
  0x29   :  { %218 = vmatprep.subr.bf16.mxu0 %v285_v1  ;;  %215 = vmatprep.mubr.msk.f32.mxu0 %vm286_vm0, %v287_v2  ;;  %v53_v4 = vld [vmem:[#allocation5 + $0x8] sm:$0xff]  ;;  %v54_v5 = vld [vmem:[#allocation5 + $0x10] sm:$0xff]  ;;  %v55_v7 = vld [vmem:[#allocation5 + $0x18] sm:$0xff]  ;;  %vm56_vm1 = vcmask 261120   ;;  %vm130_vm2 = vcmask 523264   ;;  %vm190_vm3 = vcmask 7168  }
  0x2a   :  { %v219_v6 = vpack.c.bf16 %v53_v4, %v52_v3  ;;  %v222_v8 = vpack.c.bf16 %v55_v7, %v54_v5  ;;  %v51_v9 = vld [vmem:[#allocation3] sm:$0xff]  ;;  %v155_v32 = vshrl.u32 %v154_v31, 7  ;;  %v151_v33 = vld [vmem:[%s374_s2] sm:$0x1] }
  0x2b   :  { %v199_v38 = vld [vmem:[%s375_s3] ss:$0 sm:$0xff] }
  0x2c   :  { %220 = vmatpush3.bf16.msra.mxu0 %v219_v6  ;;  %v156_v34 = vsub.s32 0, %v155_v32  ;;  %v200_v41 = vld [vmem:[%s376_s4] ss:$0 sm:$0xff] }
  0x2d   :  { %221 = vmatprep.subr.bf16.mxu0 %v285_v1  ;;  %v201_v45 = vld [vmem:[#allocation2] ss:$0 sm:$0xff] }
  0x30   :  { %223 = vmatpush3.bf16.msra.mxu0 %v222_v8 }
  0x33   :  { %216 = vmatmul.mubr.msk.f32.vlgmr.msra.gmra.mrb[0].mxu0 %vm56_vm1, %v51_v9 }
 0x106   :  { %v126_v10 = vpop.f32.mrb[0].mxu0 }
 0x107   :  { %v131_v11 = vsel %vm130_vm2, %v126_v10, 0.0  ;;  %v217_v12 = vpop.f32.mrb[1].mxu0 }
 0x108   :  { %v132_v13 = vrot.slane %v131_v11, 4 }
 0x10a   :  { %v133_v14 = vadd.f32 %v132_v13, %v131_v11 }
 0x10c   :  { %v134_v15 = vrot.slane %v133_v14, 2 }
 0x10e   :  { %v135_v16 = vadd.f32 %v134_v15, %v133_v14 }
 0x110   :  { %v136_v17 = vrot.slane %v135_v16, 1 }
 0x112   :  { %v137_v18 = vadd.f32 %v136_v17, %v135_v16 }
 0x114   :  { %v138_v19 = vmul.f32 0.125, %v137_v18 }
 0x116   :  { %v139_v20 = vsub.f32 %v126_v10, %v138_v19 }
 0x118   :  { %v140_v21 = vmul.f32 %v139_v20, %v139_v20 }
 0x11a   :  { %v141_v22 = vsel %vm130_vm2, %v140_v21, 0.0 }
 0x11b   :  { %v142_v23 = vrot.slane %v141_v22, 4 }
 0x11d   :  { %v143_v24 = vadd.f32 %v142_v23, %v141_v22 }
 0x11f   :  { %v144_v25 = vrot.slane %v143_v24, 2 }
 0x121   :  { %v145_v26 = vadd.f32 %v144_v25, %v143_v24 }
 0x123   :  { %v146_v27 = vrot.slane %v145_v26, 1 }
 0x125   :  { %v147_v28 = vadd.f32 %v146_v27, %v145_v26 }
 0x127   :  { %v148_v29 = vmul.f32 0.125, %v147_v28 }
 0x129   :  { %v149_v30 = vadd.f32 1e-05, %v148_v29 }
 0x12b   :  { %231 = vrsqrt.f32 %v149_v30 }
 0x135   :  { %v232_v35 = vpop.eup %231 }
 0x136   :  { %v152_v36 = vmul.f32 %v232_v35, %v151_v33 }
 0x138   :  { %v157_v37 = vrot.slane %v152_v36, %v156_v34 }
 0x13a   :  { %v159_v39 = vmul.f32 %v157_v37, %v139_v20 }
 0x13c   :  { %v167_v40 = vadd.f32 %v199_v38, %v159_v39 }
 0x13e   :  { %v168_v42 = vmax.f32 %v167_v40, 0.0 }
 0x140   :  { %v176_v43 = vmul.f32 %v200_v41, %v168_v42 }
 0x142   :  { %v177_v44 = vsel %vm130_vm2, %v176_v43, 0.0 }
 0x143   :  { %178 = vadd.xlane.f32.xlu0 %v177_v44 }
 0x1d0   :  { %v179_v46 = vpop.xlane.xlu0 %178 }
 0x1d1   :  { %v187_v47 = vadd.f32 %v201_v45, %v179_v46 }
 0x1d3   :  { %v188_v48 = vmax.f32 %v187_v47, 0.0 }
 0x1d5   :  { %v189_v49 = vmin.f32 %v188_v48, 6.0 }
 0x1d7   :  { %191 = vst.msk [vmem:[%s378_s6] sm:$0xff] %vm190_vm3, %v189_v49 }
 0x1d8   :  { %196 = vsyncpa [#allocation4], 1 }
 0x1d9   :  { %197 = vsyncpa [#allocation6], 1 }

</bundles_post_ra>
